<compile_context>
chip_gen: v6e
topology: v6e:2x2x1
jax: 0.10.0
libtpu: 0.0.40
codegen_flags: <defaults>
</compile_context>

<pallas_src>
import functools

import jax
import jax.numpy as jnp
from jax.experimental import pallas as pl
from jax.experimental.pallas import tpu as pltpu

_LANE = 128                 # TPU lane width; last dim of every block
_ROW_ALIGN = 8              # i32 sublane count
_TARGET_BLOCK_ROWS = 4096   # 4096 x 128 x 4B = 2 MiB per stream per buffer


def _random_override_kernel(seed_ref, x_ref, out_ref, *,
                            rows_per_block, mask_thresh, cuts, values):
    """Elementwise token override with in-kernel counter-based randomness.

    One 32-bit hash per element:
      hi 16 bits -> Bernoulli(p) decision (integer compare, no float math)
      lo 16 bits -> which replacement value (unrolled threshold select chain)
    """
    shape = x_ref.shape  # (block_rows, 128)

    # Global element index of every lane of this tile (unique across the grid).
    row0 = pl.program_id(0) * rows_per_block
    rows = row0 + jax.lax.broadcasted_iota(jnp.int32, shape, 0)
    cols = jax.lax.broadcasted_iota(jnp.int32, shape, 1)
    idx = (rows * _LANE + cols).astype(jnp.uint32)

    s0 = seed_ref[0].astype(jnp.uint32)
    s1 = seed_ref[1].astype(jnp.uint32)

    # murmur3-style fmix32 of (index, seed) — pure VPU integer ops.
    h = idx * jnp.uint32(0x9E3779B1) + s0
    h = h ^ (h >> 16)
    h = h * jnp.uint32(0x85EBCA6B)
    h = h ^ (h >> 13)
    h = h * jnp.uint32(0xC2B2AE35)
    h = h ^ (h >> 16)
    h = h ^ s1
    h = h * jnp.uint32(0x27D4EB2F)
    h = h ^ (h >> 15)

    hi = h >> 16                         # Bernoulli(p) bits
    lo = h & jnp.uint32(0xFFFF)          # value-choice bits
    override = hi < jnp.uint32(mask_thresh)

    # `values` is a small compile-time tuple -> unrolled select chain.
    repl = jnp.full(shape, values[0], dtype=x_ref.dtype)
    for i in range(1, len(values)):
        repl = jnp.where(lo >= jnp.uint32(cuts[i]),
                         jnp.asarray(values[i], dtype=x_ref.dtype), repl)

    out_ref[...] = jnp.where(override, repl, x_ref[...])


def random_override(x, key, *, p_train, values, p_eval=0.0, training=True):
    """Pallas implementation of RandomOverride.forward on the token tensor."""
    p = float(p_train) if training else float(p_eval)
    values = tuple(int(v) for v in values)
    if p <= 0.0 or not values:
        return x  # nothing can change -> skip the whole HBM pass

    # 16-bit integer thresholds (p quantized to 1/65536 — negligible).
    mask_thresh = min(max(int(round(p * 65536.0)), 0), 65536)
    n_vals = len(values)
    cuts = tuple((i * 65536) // n_vals for i in range(n_vals))

    orig_shape, orig_dtype = x.shape, x.dtype
    work = x
    if work.dtype.itemsize != 4:
        # TODO(synk): native int16/int8 id tiling (sublane 16/32) not implemented;
        # widen to int32 for the kernel and narrow afterwards.
        work = work.astype(jnp.int32)

    total = work.size
    if total == 0:
        return x

    # ---- lane-dense (rows, 128) view; no copy when already aligned ---------
    if total % _LANE == 0:
        n_rows = total // _LANE
        x2 = work.reshape(n_rows, _LANE)          # free (contiguous) reshape
        tail_pad = 0
    else:
        n_rows = pl.cdiv(total, _LANE)
        tail_pad = n_rows * _LANE - total         # < 128 padded elements
        x2 = jnp.pad(work.reshape(-1), (0, tail_pad)).reshape(n_rows, _LANE)

    # ---- tile selection: big tiles, but >=2 blocks so v7x uses both TCs ----
    if n_rows < 2 * _ROW_ALIGN:
        rows_per_block = n_rows                   # single full-array block
        n_blocks = 1
    else:
        n_blocks = max(2, pl.cdiv(n_rows, _TARGET_BLOCK_ROWS))
        rows_per_block = pl.cdiv(n_rows, n_blocks)
        rows_per_block = ((rows_per_block + _ROW_ALIGN - 1) // _ROW_ALIGN) * _ROW_ALIGN
        n_blocks = pl.cdiv(n_rows, rows_per_block)   # last block may be partial

    # Two 32-bit seed words derived from the JAX key (8 bytes, negligible).
    seed = jax.lax.bitcast_convert_type(
        jax.random.bits(key, (2,), dtype=jnp.uint32), jnp.int32)

    kernel = functools.partial(
        _random_override_kernel,
        rows_per_block=rows_per_block,
        mask_thresh=mask_thresh, cuts=cuts, values=values)

    out2 = pl.pallas_call(
        kernel,
        out_shape=jax.ShapeDtypeStruct((n_rows, _LANE), x2.dtype),
        grid_spec=pltpu.PrefetchScalarGridSpec(
            num_scalar_prefetch=1,
            grid=(n_blocks,),
            in_specs=[pl.BlockSpec((rows_per_block, _LANE),
                                   lambda i, seed_ref: (i, 0))],
            out_specs=pl.BlockSpec((rows_per_block, _LANE),
                                   lambda i, seed_ref: (i, 0)),
        ),
        compiler_params=pltpu.CompilerParams(
            dimension_semantics=("parallel",),
            vmem_limit_bytes=48 * 1024 * 1024,
        ),
    )(seed, x2)

    out = out2.reshape(-1)
    if tail_pad:
        out = out[:total]
    out = out.reshape(orig_shape)
    if out.dtype != orig_dtype:
        out = out.astype(orig_dtype)
    return out


def random_override_module(batch_dict, key, *, key_in, key_out, p_train, values,
                           p_eval=0.0, training=True):
    """Dict-level wrapper mirroring RandomOverride.forward (glue, not kernel)."""
    x = batch_dict[key_in]
    batch_dict[key_out] = random_override(
        x, key, p_train=p_train, values=values, p_eval=p_eval, training=training
    )
    return batch_dict


if __name__ == "__main__":
    root = jax.random.PRNGKey(0)
    data_key, rng_key, rng_key2 = jax.random.split(root, 3)

    values = (1, 2, 3)       # candidate override ids
    p_train = 0.3
    vocab = 32

    # ---- small lane-aligned token grid (single-block path) -----------------
    B, S = 8, 128
    x = jax.random.randint(data_key, (B, S), 0, vocab, dtype=jnp.int32)
    batch_dict = {"tokens": x}
    batch_dict = random_override_module(
        batch_dict, rng_key,
        key_in="tokens", key_out="tokens_overridden",
        p_train=p_train, values=values, training=True)
    out = jax.block_until_ready(batch_dict["tokens_overridden"])

    assert out.shape == x.shape and out.dtype == x.dtype
    changed = out != x
    in_values = jnp.zeros_like(changed)
    for v in values:
        in_values = in_values | (out == v)
    assert bool(jnp.all(jnp.where(changed, in_values, True)))
    assert bool(jnp.any(changed))

    # eval mode with p_eval = 0 is a no-op (no kernel launch)
    out_eval = random_override(
        x, rng_key, p_train=p_train, values=values, p_eval=0.0, training=False)
    assert bool(jnp.array_equal(out_eval, x))

    # ---- ragged, multi-block path (partial last block, tail padding) -------
    x_r = jax.random.randint(data_key, (3, 1000), 0, vocab, dtype=jnp.int32)
    out_r = jax.block_until_ready(
        random_override(x_r, rng_key2, p_train=p_train, values=values,
                        training=True))
    assert out_r.shape == x_r.shape and out_r.dtype == x_r.dtype
    changed_r = out_r != x_r
    in_values_r = jnp.zeros_like(changed_r)
    for v in values:
        in_values_r = in_values_r | (out_r == v)
    assert bool(jnp.all(jnp.where(changed_r, in_values_r, True)))
    frac = float(jnp.mean(changed_r.astype(jnp.float32)))
    # expected ~ p * (1 - P[replacement == original]) ~= 0.29; loose band
    assert 0.10 < frac < 0.50, frac

    print("KERNEL_OK")
</pallas_src>

<mosaic_0001>
module attributes {stable_mosaic.version = 11 : i64} {
  func.func @_random_override_kernel(%arg0: i32, %arg1: memref<2xi32, #tpu.memory_space<smem>>, %arg2: memref<8x128xi32, #tpu.memory_space<vmem>>, %arg3: memref<8x128xi32, #tpu.memory_space<vmem>>) attributes {dimension_semantics = [#tpu.dimension_semantics<parallel>], iteration_bounds = array<i64: 1>, scalar_prefetch = 1 : i64, scratch_operands = 0 : i64, tpu.core_type = #tpu.core_type<tc>, window_params = [{transform_indices = @transform_0, window_bounds = array<i64: 8, 128>}, {transform_indices = @transform_1, window_bounds = array<i64: 8, 128>}]} {
    %c8_i32 = arith.constant 8 : i32
    %0 = arith.muli %arg0, %c8_i32 : i32
    %1 = tpu.iota {dimensions = array<i32: 0>} : vector<8x128xi32>
    %2 = vector.broadcast %0 : i32 to vector<8x128xi32>
    %3 = arith.addi %2, %1 : vector<8x128xi32>
    %4 = tpu.iota {dimensions = array<i32: 1>} : vector<8x128xi32>
    %c128_i32 = arith.constant 128 : i32
    %5 = vector.broadcast %c128_i32 : i32 to vector<8x128xi32>
    %6 = arith.muli %3, %5 : vector<8x128xi32>
    %7 = arith.addi %6, %4 : vector<8x128xi32>
    %c0 = arith.constant 0 : index
    %8 = memref.load %arg1[%c0] : memref<2xi32, #tpu.memory_space<smem>>
    %c1 = arith.constant 1 : index
    %9 = memref.load %arg1[%c1] : memref<2xi32, #tpu.memory_space<smem>>
    %c-1640531535_i32 = arith.constant -1640531535 : i32
    %10 = vector.broadcast %c-1640531535_i32 : i32 to vector<8x128xi32>
    %11 = arith.muli %7, %10 : vector<8x128xi32>
    %12 = vector.broadcast %8 : i32 to vector<8x128xi32>
    %13 = arith.addi %11, %12 : vector<8x128xi32>
    %c16_i32 = arith.constant 16 : i32
    %14 = vector.broadcast %c16_i32 : i32 to vector<8x128xi32>
    %15 = arith.shrui %13, %14 : vector<8x128xi32>
    %16 = arith.xori %13, %15 : vector<8x128xi32>
    %c-2048144789_i32 = arith.constant -2048144789 : i32
    %17 = vector.broadcast %c-2048144789_i32 : i32 to vector<8x128xi32>
    %18 = arith.muli %16, %17 : vector<8x128xi32>
    %c13_i32 = arith.constant 13 : i32
    %19 = vector.broadcast %c13_i32 : i32 to vector<8x128xi32>
    %20 = arith.shrui %18, %19 : vector<8x128xi32>
    %21 = arith.xori %18, %20 : vector<8x128xi32>
    %c-1028477387_i32 = arith.constant -1028477387 : i32
    %22 = vector.broadcast %c-1028477387_i32 : i32 to vector<8x128xi32>
    %23 = arith.muli %21, %22 : vector<8x128xi32>
    %c16_i32_0 = arith.constant 16 : i32
    %24 = vector.broadcast %c16_i32_0 : i32 to vector<8x128xi32>
    %25 = arith.shrui %23, %24 : vector<8x128xi32>
    %26 = arith.xori %23, %25 : vector<8x128xi32>
    %27 = vector.broadcast %9 : i32 to vector<8x128xi32>
    %28 = arith.xori %26, %27 : vector<8x128xi32>
    %c668265263_i32 = arith.constant 668265263 : i32
    %29 = vector.broadcast %c668265263_i32 : i32 to vector<8x128xi32>
    %30 = arith.muli %28, %29 : vector<8x128xi32>
    %c15_i32 = arith.constant 15 : i32
    %31 = vector.broadcast %c15_i32 : i32 to vector<8x128xi32>
    %32 = arith.shrui %30, %31 : vector<8x128xi32>
    %33 = arith.xori %30, %32 : vector<8x128xi32>
    %c16_i32_1 = arith.constant 16 : i32
    %34 = vector.broadcast %c16_i32_1 : i32 to vector<8x128xi32>
    %35 = arith.shrui %33, %34 : vector<8x128xi32>
    %c65535_i32 = arith.constant 65535 : i32
    %36 = vector.broadcast %c65535_i32 : i32 to vector<8x128xi32>
    %37 = arith.andi %33, %36 : vector<8x128xi32>
    %c19661_i32 = arith.constant 19661 : i32
    %38 = vector.broadcast %c19661_i32 : i32 to vector<8x128xi32>
    %39 = arith.cmpi ult, %35, %38 : vector<8x128xi32>
    %c1_i32 = arith.constant 1 : i32
    %40 = vector.broadcast %c1_i32 : i32 to vector<8x128xi32>
    %c21845_i32 = arith.constant 21845 : i32
    %41 = vector.broadcast %c21845_i32 : i32 to vector<8x128xi32>
    %42 = arith.cmpi uge, %37, %41 : vector<8x128xi32>
    %c2_i32 = arith.constant 2 : i32
    %43 = vector.broadcast %c2_i32 : i32 to vector<8x128xi32>
    %44 = arith.select %42, %43, %40 : vector<8x128xi1>, vector<8x128xi32>
    %c43690_i32 = arith.constant 43690 : i32
    %45 = vector.broadcast %c43690_i32 : i32 to vector<8x128xi32>
    %46 = arith.cmpi uge, %37, %45 : vector<8x128xi32>
    %c3_i32 = arith.constant 3 : i32
    %47 = vector.broadcast %c3_i32 : i32 to vector<8x128xi32>
    %48 = arith.select %46, %47, %44 : vector<8x128xi1>, vector<8x128xi32>
    %c0_2 = arith.constant 0 : index
    %c0_3 = arith.constant 0 : index
    %49 = vector.load %arg2[%c0_2, %c0_3] : memref<8x128xi32, #tpu.memory_space<vmem>>, vector<8x128xi32>
    %50 = arith.select %39, %48, %49 : vector<8x128xi1>, vector<8x128xi32>
    %c0_4 = arith.constant 0 : index
    %c0_5 = arith.constant 0 : index
    %51 = vector.load %arg3[%c0_4, %c0_5] : memref<8x128xi32, #tpu.memory_space<vmem>>, vector<8x128xi32>
    tpu.vector_store %arg3[%c0_4, %c0_5], %50 {strides = array<i32>} : memref<8x128xi32, #tpu.memory_space<vmem>>, vector<8x128xi32>,
    return
  }
  func.func @transform_0(%arg0: i32, %arg1: memref<2xi32, #tpu.memory_space<smem>>) -> (i32, i32) {
    %c0_i32 = arith.constant 0 : i32
    %c0_i32_0 = arith.constant 0 : i32
    return %arg0, %c0_i32 : i32, i32
  }
  func.func @transform_1(%arg0: i32, %arg1: memref<2xi32, #tpu.memory_space<smem>>) -> (i32, i32) {
    %c0_i32 = arith.constant 0 : i32
    %c0_i32_0 = arith.constant 0 : i32
    return %arg0, %c0_i32 : i32, i32
  }
}

</mosaic_0001>

<bundles_post_ra>
// kernel: tpu_custom_call.1
= control target key start
LH: loop header
LB: loop body
LE: loop exit
PB: predicated region body
PF: predicated region fallthrough
CT: control target
= control target key end

     0   :  { %s137_s9 = smov [#allocation3]   ;;  %s165_s0 = inlined_call_operand.hbm [shape: s32[2], index: 0, kind: input, shape index: {}]   ;;  %s166_s1 = inlined_call_operand.hbm [shape: s32[8,128], index: 1, kind: input, shape index: {}]   ;;  %s167_s2 = inlined_call_operand.hbm [shape: s32[8,128], index: 2, kind: output, shape index: {}]  }
   0x1   :  { %8 = dma.hbm_to_smem %s165_s0, 16, %s137_s9, [#allocation2] }
   0x2   :  { %131 = dma.done.wait [#allocation2], 16 }
   0x3   :  { %132 = vsyncadd [#allocation2], 4294967280 }
   0x4   :  { %10 = sfence }
   0x5   :  { %11 = vsyncpa [#allocation5], 0 }
   0x6   :  { %12 = vsyncpa [#allocation6], 0  ;;  %s138_s12 = smov [#allocation4]  }
   0x7   :  { %s19_s13 = sshll.u32 %s138_s12, 4  ;;  %s20_s13 = int_to_ptr.vmem [resolvable:$true] %s19_s13 }
   0x8   :  { %s99_s14 = scalar_lea.vmem %s20_s13, 128  ;;  %p104_p1 = scmp.lt.s32.totalorder %s20_s13, %s20_s13 }
   0x9   :  { %p100_p0 = scmp.ne.s32.totalorder %s20_s13, %s99_s14  ;;  %p105_p2 = scmp.lt.s32.totalorder %s99_s14, %s99_s14 }
   0xb   :  { %p106_p3 = por %p105_p2, %p104_p1 }
   0xd   :  { %p107_p4 = pnand %p106_p3, %p100_p0 }
   0xf   :  { %110 = shalt.err (!%p107_p4)
}
  0x10   :  { %22 = dma.hbm_to_vmem [thread:$0]  %s166_s1, 128, %s20_s13, [#allocation5]  }
  0x11   :  { %133 = dma.done.wait [#allocation5], 128  }
  0x12   :  { %134 = vsyncadd [#allocation5], 4294967168  ;;  %v27_v0 = vlaneseq  ;;  %s35_s0 = sld [smem:[#allocation3]]  ;;  %s139_s1 = smov [#allocation7]   ;;  %v60_v23 = vld [vmem:[#allocation4] sm:$0xff]  ;;  %v140_v24 = vmov 1  }
  0x13   :  { %s78_s17 = sld [smem:[#allocation3 + $0x1]]  ;;  %s69_s18 = sshll.u32 %s139_s1, 4  ;;  %s70_s18 = int_to_ptr.vmem [resolvable:$true] %s69_s18 }
  0x14   :  { %v28_v1 = vshrl.u32 %v27_v0, 7  ;;  %v32_v2 = vand.u32 127, %v27_v0  ;;  %s111_s19 = scalar_lea.vmem %s70_s18, 128  ;;  %p116_p6 = scmp.lt.s32.totalorder %s70_s18, %s70_s18 }
  0x15   :  { %p112_p5 = scmp.ne.s32.totalorder %s70_s18, %s111_s19  ;;  %p117_p7 = scmp.lt.s32.totalorder %s111_s19, %s111_s19 }
  0x16   :  { %v33_v3 = vmul.u32 128, %v28_v1 }
  0x17   :  { %p118_p8 = por %p117_p7, %p116_p6 }
  0x18   :  { %v34_v4 = vadd.s32 %v33_v3, %v32_v2  ;;  %v38_v5 = vstv %s35_s0 }
  0x19   :  { %v48_v15 = vstv %s78_s17  ;;  %p119_p9 = pnand %p118_p8, %p112_p5 }
  0x1a   :  { %v37_v6 = vmul.u32 2654435761, %v34_v4 }
  0x1c   :  { %v39_v7 = vadd.s32 %v38_v5, %v37_v6 }
  0x1e   :  { %v40_v8 = vshrl.u32 %v39_v7, 16 }
  0x20   :  { %v41_v9 = vxor.u32 %v40_v8, %v39_v7 }
  0x22   :  { %v42_v10 = vmul.u32 2246822507, %v41_v9 }
  0x24   :  { %v43_v11 = vshrl.u32 %v42_v10, 13 }
  0x26   :  { %v44_v12 = vxor.u32 %v43_v11, %v42_v10 }
  0x28   :  { %v45_v13 = vmul.u32 3266489909, %v44_v12 }
  0x2a   :  { %v46_v14 = vshrl.u32 %v45_v13, 16 }
  0x2c   :  { %v47_v16 = vxor.u32 %v46_v14, %v45_v13 }
  0x2e   :  { %v49_v17 = vxor.u32 %v48_v15, %v47_v16 }
  0x30   :  { %v50_v18 = vmul.u32 668265263, %v49_v17 }
  0x32   :  { %v51_v19 = vshrl.u32 %v50_v18, 15 }
  0x34   :  { %v52_v20 = vxor.u32 %v51_v19, %v50_v18 }
  0x36   :  { %v53_v21 = vshrl.u32 %v52_v20, 16  ;;  %v54_v22 = vand.u32 65535, %v52_v20 }
  0x38   :  { %vm55_vm0 = vcmp.lt.u32.totalorder %v53_v21, 19661  ;;  %vm56_vm1 = vcmp.ge.u32.totalorder %v54_v22, 21845  ;;  %vm58_vm2 = vcmp.ge.u32.totalorder %v54_v22, 43690 }
  0x39   :  { %v57_v25 = vsel %vm56_vm1, 2, %v140_v24 }
  0x3a   :  { %v59_v26 = vsel %vm58_vm2, 3, %v57_v25 }
  0x3b   :  { %v61_v27 = vsel %vm55_vm0, %v59_v26, %v60_v23 }
  0x3c   :  { %62 = vst [vmem:[#allocation7] sm:$0xff] %v61_v27 }
  0x3d   :  { %122 = shalt.err (!%p119_p9)
}
  0x3e   :  { %72 = dma.vmem_to_hbm [thread:$0]  %s70_s18, 128, %s167_s2, [#allocation6]  }
  0x3f   :  { %135 = dma.done.wait [#allocation6], 128  }
  0x40   :  { %136 = vsyncadd [#allocation6], 4294967168 }
  0x41   :  { %76 = vsyncpa [#allocation5], 1 }
  0x42   :  { %77 = vsyncpa [#allocation6], 1 }

</bundles_post_ra>
